<compile_context>
chip_gen: v6e
topology: v6e:2x2x1
jax: 0.10.0
libtpu: 0.0.40
codegen_flags: <defaults>
</compile_context>

<pallas_src>
import functools

import jax
import jax.numpy as jnp
from jax.experimental import pallas as pl
from jax.experimental.pallas import tpu as pltpu


def _round_up(x, m):
    return ((x + m - 1) // m) * m


def _segment_mlp1_kernel(
    ns_ref,            # (TILE_N, D_in)       bf16   node-state tile (streamed)
    gidx_ref,          # (1, TILE_N)          int32  graph id per node (-1 = pad)
    w1_ref, b1_ref,    # (D_in, 64) bf16,     (1, 64)  f32
    w2_ref, b2_ref,    # (64, 2G)   bf16,     (1, 2G)  f32   gate|value fused
    acc_ref,           # (1, N_GRAPHS_PAD, G) f32   resident partial segment sums
    *, graph_block, graph_state_dim,
):
    ni = pl.program_id(1)   # node-tile index ("arbitrary" reduction axis)

    @pl.when(ni == 0)
    def _init():
        acc_ref[...] = jnp.zeros_like(acc_ref)

    G = graph_state_dim
    tile_n = ns_ref.shape[0]

    # ---- MLP1, computed once per node tile (bf16 MXU inputs, f32 accum) ----
    x = ns_ref[...]                                                    # bf16
    h1 = jnp.dot(x, w1_ref[...], preferred_element_type=jnp.float32) + b1_ref[...]
    h1 = jnp.maximum(h1, 0.0).astype(jnp.bfloat16)                     # (TILE_N, 64)
    g2 = jnp.dot(h1, w2_ref[...], preferred_element_type=jnp.float32) + b2_ref[...]
    gates = jax.nn.sigmoid(g2[:, :G])                                  # (TILE_N, G)
    gated = (g2[:, G:] * gates).astype(jnp.bfloat16)                   # (TILE_N, G)

    # ---- unsorted_segment_sum: one-hot matmul per graph block --------------
    gidx = gidx_ref[...]                                               # (1, TILE_N)
    # gi-independent iota, hoisted out of the graph-block loop.
    block_iota = jax.lax.broadcasted_iota(jnp.int32, (graph_block, tile_n), 0)
    n_graph_blocks = acc_ref.shape[1] // graph_block
    for b in range(n_graph_blocks):        # static loop; small for real n_graphs
        gidx_local = gidx - b * graph_block
        onehot = (block_iota == gidx_local).astype(jnp.bfloat16)       # exact in bf16
        part = jnp.dot(onehot, gated, preferred_element_type=jnp.float32)
        acc_ref[0, b * graph_block:(b + 1) * graph_block, :] += part


def _mlp2_kernel(part_ref, w3_ref, b3_ref, w4_ref, b4_ref, out_ref):
    # Combine per-core partial segment sums and apply MLP2, all in f32.
    seg = jnp.sum(part_ref[...], axis=0)                               # (NG_PAD, G)
    h2 = jnp.dot(seg, w3_ref[...], preferred_element_type=jnp.float32) + b3_ref[...]
    h2 = jnp.maximum(h2, 0.0)                                          # (NG_PAD, 32)
    out_ref[...] = (
        jnp.dot(h2, w4_ref[...], preferred_element_type=jnp.float32) + b4_ref[...]
    )                                                                  # (NG_PAD, 128)


def graph_aggregator_forward(node_states, graph_idx, params, *,
                             graph_state_dim, n_graphs, tile_n=8192):
    """Pallas-accelerated GraphAggregator.forward.

    node_states: (N, D_in) float32
    graph_idx:   (N,) int32
    params:      weights stored as (in, out), biases as (1, out)
    n_graphs:    static number of graphs (avoids host sync / recompiles)
    """
    N, d_in = node_states.shape
    G = graph_state_dim
    out_dim = params["w4"].shape[1]                       # 16

    # -- static blocking choices ----------------------------------------------
    tile_n = min(tile_n, _round_up(N, 128))               # multiple of 128
    n_tiles = -(-N // tile_n)
    n_split = 2 if n_tiles >= 2 else 1                    # feed v7x's 2nd TensorCore
    n_tiles = _round_up(n_tiles, n_split)
    n_pad = n_tiles * tile_n
    tiles_per_split = n_tiles // n_split

    if n_graphs <= 256:
        graph_block = _round_up(n_graphs, 8)
    else:
        graph_block = 256                                 # TODO(synk): 128 may suit v5e better
    n_graphs_pad = _round_up(n_graphs, graph_block)

    # -- host-side prep: bf16 weights, fused w2, lane padding -----------------
    ns_p = jnp.pad(node_states, ((0, n_pad - N), (0, 0))).astype(jnp.bfloat16)
    gidx_p = jnp.pad(graph_idx.astype(jnp.int32), (0, n_pad - N),
                     constant_values=-1).reshape(1, n_pad)   # -1 rows never match

    w1 = params["w1"].astype(jnp.bfloat16)
    b1 = params["b1"].astype(jnp.float32)
    w2 = params["w2"].astype(jnp.bfloat16)                # fused gate|value (64, 2G)
    b2 = params["b2"].astype(jnp.float32)
    w3 = params["w3"].astype(jnp.float32)                 # MLP2 kept in f32 (tiny)
    b3 = params["b3"].astype(jnp.float32)
    w4 = jnp.pad(params["w4"], ((0, 0), (0, 128 - out_dim))).astype(jnp.float32)
    b4 = jnp.pad(params["b4"], ((0, 0), (0, 128 - out_dim))).astype(jnp.float32)

    const = lambda si, ni: (0, 0)          # weights/biases stay VMEM-resident
    kernel1 = functools.partial(_segment_mlp1_kernel,
                                graph_block=graph_block, graph_state_dim=G)

    # Kernel 1: MLP1 + gated segment sum. Each split writes its own partial
    # (n_graphs_pad, G) f32 block, accumulated in VMEM across node tiles.
    partials = pl.pallas_call(
        kernel1,
        out_shape=jax.ShapeDtypeStruct((n_split, n_graphs_pad, G), jnp.float32),
        grid=(n_split, tiles_per_split),
        in_specs=[
            pl.BlockSpec((tile_n, d_in),
                         lambda si, ni: (si * tiles_per_split + ni, 0)),
            pl.BlockSpec((1, tile_n),
                         lambda si, ni: (0, si * tiles_per_split + ni)),
            pl.BlockSpec(w1.shape, const), pl.BlockSpec(b1.shape, const),
            pl.BlockSpec(w2.shape, const), pl.BlockSpec(b2.shape, const),
        ],
        out_specs=pl.BlockSpec((1, n_graphs_pad, G), lambda si, ni: (si, 0, 0)),
        compiler_params=pltpu.CompilerParams(
            dimension_semantics=("parallel", "arbitrary"),
            vmem_limit_bytes=32 * 1024 * 1024,
        ),
    )(ns_p, gidx_p, w1, b1, w2, b2)

    # Kernel 2: combine partials + MLP2 (f32), lane-dense (NG_PAD, 128) store.
    out_pad = pl.pallas_call(
        _mlp2_kernel,
        out_shape=jax.ShapeDtypeStruct((n_graphs_pad, 128), jnp.float32),
    )(partials, w3, b3, w4, b4)

    # slice away graph-row padding and the lane padding of the last layer
    return out_pad[:n_graphs, :out_dim]


def _reference_forward(node_states, graph_idx, params, *, graph_state_dim, n_graphs):
    """Plain-JAX f32 reference matching the PyTorch module semantics."""
    G = graph_state_dim
    h = jnp.maximum(node_states @ params["w1"] + params["b1"], 0.0)
    g = h @ params["w2"] + params["b2"]
    gates = jax.nn.sigmoid(g[:, :G])
    gated = g[:, G:] * gates
    seg = jax.ops.segment_sum(gated, graph_idx, num_segments=n_graphs)
    h2 = jnp.maximum(seg @ params["w3"] + params["b3"], 0.0)
    return h2 @ params["w4"] + params["b4"]


def make_params(key, d_in, graph_state_dim):
    """Deterministic synthetic parameters.

    PyTorch Linear stores weight as (out, in); here we store the transpose
    (in, out) so the kernel computes x @ W + b directly.
    MLP1: Linear(d_in, 64) -> ReLU -> Linear(64, 2*G)
    MLP2: Linear(G, 32)    -> ReLU -> Linear(32, 16)
    """
    G = graph_state_dim
    ks = jax.random.split(key, 8)
    scale = 0.1
    return {
        "w1": scale * jax.random.normal(ks[0], (d_in, 64), jnp.float32),
        "b1": scale * jax.random.normal(ks[1], (1, 64), jnp.float32),
        "w2": scale * jax.random.normal(ks[2], (64, 2 * G), jnp.float32),
        "b2": scale * jax.random.normal(ks[3], (1, 2 * G), jnp.float32),
        "w3": scale * jax.random.normal(ks[4], (G, 32), jnp.float32),
        "b3": scale * jax.random.normal(ks[5], (1, 32), jnp.float32),
        "w4": scale * jax.random.normal(ks[6], (32, 16), jnp.float32),
        "b4": scale * jax.random.normal(ks[7], (1, 16), jnp.float32),
    }


if __name__ == "__main__":
    # Module config: node_hidden_sizes=[32] -> graph_state_dim=32, MLP1 out = 64.
    # input_size=[32].  Small example: N=8 nodes split across 2 graphs.
    D_IN = 32
    GRAPH_STATE_DIM = 32
    N_NODES = 8
    N_GRAPHS = 2

    key = jax.random.PRNGKey(0)
    k_params, k_nodes = jax.random.split(key)

    params = make_params(k_params, D_IN, GRAPH_STATE_DIM)
    node_states = jax.random.normal(k_nodes, (N_NODES, D_IN), jnp.float32)
    graph_idx = jnp.array([0, 0, 0, 1, 1, 1, 1, 0], dtype=jnp.int32)

    out = graph_aggregator_forward(
        node_states, graph_idx, params,
        graph_state_dim=GRAPH_STATE_DIM, n_graphs=N_GRAPHS,
    )
    out = jax.block_until_ready(out)

    ref = _reference_forward(
        node_states, graph_idx, params,
        graph_state_dim=GRAPH_STATE_DIM, n_graphs=N_GRAPHS,
    )
    assert out.shape == ref.shape == (N_GRAPHS, 16)
    # bf16 MLP1 inputs with f32 accumulation (MLP2 fully f32) -> modest tolerance.
    assert jnp.allclose(out, ref, atol=2e-2, rtol=2e-2), "mismatch vs reference"

    print("KERNEL_OK")
</pallas_src>

<mosaic_0001>
module attributes {stable_mosaic.version = 11 : i64} {
  func.func @_segment_mlp1_kernel(%arg0: i32, %arg1: i32, %arg2: memref<128x32xbf16, #tpu.memory_space<vmem>>, %arg3: memref<1x128xi32, #tpu.memory_space<vmem>>, %arg4: memref<32x64xbf16, #tpu.memory_space<vmem>>, %arg5: memref<1x64xf32, #tpu.memory_space<vmem>>, %arg6: memref<64x64xbf16, #tpu.memory_space<vmem>>, %arg7: memref<1x64xf32, #tpu.memory_space<vmem>>, %arg8: memref<1x8x32xf32, #tpu.memory_space<vmem>>) attributes {dimension_semantics = [#tpu.dimension_semantics<parallel>, #tpu.dimension_semantics<arbitrary>], iteration_bounds = array<i64: 1, 1>, scalar_prefetch = 0 : i64, scratch_operands = 0 : i64, tpu.core_type = #tpu.core_type<tc>, window_params = [{transform_indices = @transform_0, window_bounds = array<i64: 128, 32>}, {transform_indices = @transform_1, window_bounds = array<i64: 1, 128>}, {pipeline_mode = #tpu.pipeline_mode<synchronous>, transform_indices = @transform_2, window_bounds = array<i64: 32, 64>}, {pipeline_mode = #tpu.pipeline_mode<synchronous>, transform_indices = @transform_3, window_bounds = array<i64: 1, 64>}, {pipeline_mode = #tpu.pipeline_mode<synchronous>, transform_indices = @transform_4, window_bounds = array<i64: 64, 64>}, {pipeline_mode = #tpu.pipeline_mode<synchronous>, transform_indices = @transform_5, window_bounds = array<i64: 1, 64>}, {transform_indices = @transform_6, window_bounds = array<i64: 1, 8, 32>}]} {
    %c0_i32 = arith.constant 0 : i32
    %0 = arith.cmpi eq, %arg1, %c0_i32 : i32
    %1 = arith.extui %0 : i1 to i32
    %c0_i32_0 = arith.constant 0 : i32
    %2 = arith.cmpi ne, %1, %c0_i32_0 : i32
    scf.if %2 {
      %cst_23 = arith.constant 0.000000e+00 : f32
      %42 = vector.broadcast %cst_23 : f32 to vector<1x8x32xf32>
      %c0_24 = arith.constant 0 : index
      %c0_25 = arith.constant 0 : index
      %c0_26 = arith.constant 0 : index
      %43 = vector.load %arg8[%c0_24, %c0_25, %c0_26] : memref<1x8x32xf32, #tpu.memory_space<vmem>>, vector<1x8x32xf32>
      tpu.vector_store %arg8[%c0_24, %c0_25, %c0_26], %42 {strides = array<i32>} : memref<1x8x32xf32, #tpu.memory_space<vmem>>, vector<1x8x32xf32>,
    } else {
    }
    %c0 = arith.constant 0 : index
    %c0_1 = arith.constant 0 : index
    %3 = vector.load %arg2[%c0, %c0_1] : memref<128x32xbf16, #tpu.memory_space<vmem>>, vector<128x32xbf16>
    %c0_2 = arith.constant 0 : index
    %c0_3 = arith.constant 0 : index
    %4 = vector.load %arg4[%c0_2, %c0_3] : memref<32x64xbf16, #tpu.memory_space<vmem>>, vector<32x64xbf16>
    %cst = arith.constant dense<0.000000e+00> : vector<128x64xf32>
    %5 = tpu.matmul %3, %4, %cst {dimension_numbers = #tpu.dot_dimension_numbers<[1], [0], [0], [1], [0, 0, 1, 1], [], []>} : vector<128x32xbf16>, vector<32x64xbf16>, vector<128x64xf32> -> vector<128x64xf32>
    %c0_4 = arith.constant 0 : index
    %c0_5 = arith.constant 0 : index
    %6 = vector.load %arg5[%c0_4, %c0_5] : memref<1x64xf32, #tpu.memory_space<vmem>>, vector<1x64xf32>
    %7 = vector.broadcast %6 : vector<1x64xf32> to vector<128x64xf32>
    %8 = arith.addf %5, %7 : vector<128x64xf32>
    %cst_6 = arith.constant 0.000000e+00 : f32
    %9 = vector.broadcast %cst_6 : f32 to vector<128x64xf32>
    %10 = arith.maximumf %8, %9 : vector<128x64xf32>
    %11 = arith.truncf %10 : vector<128x64xf32> to vector<128x64xbf16>
    %c0_7 = arith.constant 0 : index
    %c0_8 = arith.constant 0 : index
    %12 = vector.load %arg6[%c0_7, %c0_8] : memref<64x64xbf16, #tpu.memory_space<vmem>>, vector<64x64xbf16>
    %cst_9 = arith.constant dense<0.000000e+00> : vector<128x64xf32>
    %13 = tpu.matmul %11, %12, %cst_9 {dimension_numbers = #tpu.dot_dimension_numbers<[1], [0], [0], [1], [0, 0, 1, 1], [], []>} : vector<128x64xbf16>, vector<64x64xbf16>, vector<128x64xf32> -> vector<128x64xf32>
    %c0_10 = arith.constant 0 : index
    %c0_11 = arith.constant 0 : index
    %14 = vector.load %arg7[%c0_10, %c0_11] : memref<1x64xf32, #tpu.memory_space<vmem>>, vector<1x64xf32>
    %15 = vector.broadcast %14 : vector<1x64xf32> to vector<128x64xf32>
    %16 = arith.addf %13, %15 : vector<128x64xf32>
    %17 = vector.extract_strided_slice %16 {offsets = [0, 0], sizes = [128, 32], strides = [1, 1]} : vector<128x64xf32> to vector<128x32xf32>
    %18 = arith.negf %17 : vector<128x32xf32>
    %19 = math.exp %18 : vector<128x32xf32>
    %cst_12 = arith.constant 1.000000e+00 : f32
    %20 = vector.broadcast %cst_12 : f32 to vector<128x32xf32>
    %21 = arith.addf %20, %19 : vector<128x32xf32>
    %22 = arith.divf %20, %21 : vector<128x32xf32>
    %23 = vector.extract_strided_slice %16 {offsets = [0, 32], sizes = [128, 32], strides = [1, 1]} : vector<128x64xf32> to vector<128x32xf32>
    %24 = arith.mulf %23, %22 : vector<128x32xf32>
    %25 = arith.truncf %24 : vector<128x32xf32> to vector<128x32xbf16>
    %c0_13 = arith.constant 0 : index
    %c0_14 = arith.constant 0 : index
    %26 = vector.load %arg3[%c0_13, %c0_14] : memref<1x128xi32, #tpu.memory_space<vmem>>, vector<1x128xi32>
    %27 = tpu.iota {dimensions = array<i32: 0>} : vector<8x128xi32>
    %c0_i32_15 = arith.constant 0 : i32
    %28 = vector.broadcast %c0_i32_15 : i32 to vector<1x128xi32>
    %29 = arith.subi %26, %28 : vector<1x128xi32>
    %30 = vector.broadcast %29 : vector<1x128xi32> to vector<8x128xi32>
    %31 = arith.cmpi eq, %27, %30 : vector<8x128xi32>
    %32 = arith.extui %31 : vector<8x128xi1> to vector<8x128xi32>
    %33 = arith.sitofp %32 : vector<8x128xi32> to vector<8x128xf32>
    %34 = arith.truncf %33 : vector<8x128xf32> to vector<8x128xbf16>
    %cst_16 = arith.constant dense<0.000000e+00> : vector<8x32xf32>
    %35 = tpu.matmul %34, %25, %cst_16 {dimension_numbers = #tpu.dot_dimension_numbers<[1], [0], [0], [1], [0, 0, 1, 1], [], []>} : vector<8x128xbf16>, vector<128x32xbf16>, vector<8x32xf32> -> vector<8x32xf32>
    %c0_17 = arith.constant 0 : index
    %c0_18 = arith.constant 0 : index
    %c0_19 = arith.constant 0 : index
    %36 = vector.load %arg8[%c0_17, %c0_18, %c0_19] : memref<1x8x32xf32, #tpu.memory_space<vmem>>, vector<1x8x32xf32>
    %37 = vector.shape_cast %36 : vector<1x8x32xf32> to vector<8x32xf32>
    %38 = arith.addf %37, %35 : vector<8x32xf32>
    %c0_20 = arith.constant 0 : index
    %c0_21 = arith.constant 0 : index
    %c0_22 = arith.constant 0 : index
    %39 = vector.load %arg8[%c0_20, %c0_21, %c0_22] : memref<1x8x32xf32, #tpu.memory_space<vmem>>, vector<1x8x32xf32>
    %40 = vector.shape_cast %39 : vector<1x8x32xf32> to vector<8x32xf32>
    %41 = vector.shape_cast %38 : vector<8x32xf32> to vector<1x8x32xf32>
    tpu.vector_store %arg8[%c0_20, %c0_21, %c0_22], %41 {strides = array<i32>} : memref<1x8x32xf32, #tpu.memory_space<vmem>>, vector<1x8x32xf32>,
    return
  }
  func.func @transform_0(%arg0: i32, %arg1: i32) -> (i32, i32) {
    %c1_i32 = arith.constant 1 : i32
    %0 = arith.muli %arg0, %c1_i32 : i32
    %1 = arith.addi %0, %arg1 : i32
    %c0_i32 = arith.constant 0 : i32
    %c0_i32_0 = arith.constant 0 : i32
    return %1, %c0_i32 : i32, i32
  }
  func.func @transform_1(%arg0: i32, %arg1: i32) -> (i32, i32) {
    %c1_i32 = arith.constant 1 : i32
    %0 = arith.muli %arg0, %c1_i32 : i32
    %1 = arith.addi %0, %arg1 : i32
    %c0_i32 = arith.constant 0 : i32
    %c0_i32_0 = arith.constant 0 : i32
    return %c0_i32, %1 : i32, i32
  }
  func.func @transform_2(%arg0: i32, %arg1: i32) -> (i32, i32) {
    %c0_i32 = arith.constant 0 : i32
    %c0_i32_0 = arith.constant 0 : i32
    %c0_i32_1 = arith.constant 0 : i32
    return %c0_i32, %c0_i32_0 : i32, i32
  }
  func.func @transform_3(%arg0: i32, %arg1: i32) -> (i32, i32) {
    %c0_i32 = arith.constant 0 : i32
    %c0_i32_0 = arith.constant 0 : i32
    %c0_i32_1 = arith.constant 0 : i32
    return %c0_i32, %c0_i32_0 : i32, i32
  }
  func.func @transform_4(%arg0: i32, %arg1: i32) -> (i32, i32) {
    %c0_i32 = arith.constant 0 : i32
    %c0_i32_0 = arith.constant 0 : i32
    %c0_i32_1 = arith.constant 0 : i32
    return %c0_i32, %c0_i32_0 : i32, i32
  }
  func.func @transform_5(%arg0: i32, %arg1: i32) -> (i32, i32) {
    %c0_i32 = arith.constant 0 : i32
    %c0_i32_0 = arith.constant 0 : i32
    %c0_i32_1 = arith.constant 0 : i32
    return %c0_i32, %c0_i32_0 : i32, i32
  }
  func.func @transform_6(%arg0: i32, %arg1: i32) -> (i32, i32, i32) {
    %c0_i32 = arith.constant 0 : i32
    %c0_i32_0 = arith.constant 0 : i32
    %c0_i32_1 = arith.constant 0 : i32
    return %arg0, %c0_i32, %c0_i32_0 : i32, i32, i32
  }
}

</mosaic_0001>

<bundles_post_ra>
// kernel: tpu_custom_call.1
= control target key start
LH: loop header
LB: loop body
LE: loop exit
PB: predicated region body
PF: predicated region fallthrough
CT: control target
= control target key end

     0   :  { %vm65_vm0 = vcmask 261120   ;;  %s1210_s0 = inlined_call_operand.vmem [shape: bf16[128,32], index: 0, kind: input, shape index: {}]   ;;  %s1211_s1 = inlined_call_operand.vmem [shape: s32[1,128], index: 1, kind: input, shape index: {}]   ;;  %s1212_s2 = inlined_call_operand.vmem [shape: bf16[32,64], index: 2, kind: input, shape index: {}]   ;;  %s1213_s3 = inlined_call_operand.vmem [shape: f32[1,64], index: 3, kind: input, shape index: {}]   ;;  %s1214_s4 = inlined_call_operand.vmem [shape: bf16[64,64], index: 4, kind: input, shape index: {}]   ;;  %s1215_s5 = inlined_call_operand.vmem [shape: f32[1,64], index: 5, kind: input, shape index: {}]   ;;  %s1216_s6 = inlined_call_operand.hbm [shape: f32[1,8,32], index: 6, kind: output, shape index: {}]  }
   0x1   :  { %v899_v0 = vld [vmem:[%s1212_s2 + $0x8] sm:$0xff]   ;;  %v900_v1 = vld [vmem:[%s1212_s2] sm:$0xff]   ;;  %v903_v4 = vld [vmem:[%s1210_s0 + $0x10] sm:$0xff]  }
   0x2   :  { %829 = vmatprep.subr.bf16.mxu0 %v899_v0  ;;  %v901_v2 = vld [vmem:[%s1210_s0] sm:$0xff]   ;;  %v902_v3 = vld [vmem:[%s1210_s0 + $0x8] sm:$0xff]   ;;  %v909_v5 = vld [vmem:[%s1214_s4 + $0x18] sm:$0xff]  }
   0x3   :  { %830 = vmatpush3.bf16.msra.mxu0 %v899_v0  ;;  %833 = vmatprep.mubr.msk.bf16.mxu0 %vm65_vm0, %v901_v2 }
   0x4   :  { %831 = vmatprep.subr.bf16.mxu0 %v900_v1  ;;  %849 = vmatprep.subr.bf16.mxu1 %v909_v5 }
   0x5   :  { %850 = vmatpush3.bf16.msra.mxu1 %v909_v5 }
   0x7   :  { %832 = vmatpush3.bf16.msra.mxu0 %v900_v1 }
   0xa   :  { %834 = vmatmul.mubr.msk.bf16.vlgmr.msra.gmra.mxu0 %vm65_vm0, %v902_v3 }
   0xb   :  { %837 = vmatprep.mubr.msk.bf16.mxu0 %vm65_vm0, %v903_v4 }
   0xc   :  { %11 = vsyncpa [#allocation3], 0  ;;  %v904_v6 = vld [vmem:[%s1210_s0 + $0x18] sm:$0xff]   ;;  %v905_v7 = vld [vmem:[%s1210_s0 + $0x20] sm:$0xff]   ;;  %vm331_vm1 = vcmask 523264   ;;  %s1001_s25 = smov 96  }
   0xd   :  { %v906_v8 = vld [vmem:[%s1210_s0 + $0x28] sm:$0xff]   ;;  %v907_v9 = vld [vmem:[%s1210_s0 + $0x30] sm:$0xff]   ;;  %v908_v10 = vld [vmem:[%s1210_s0 + $0x38] sm:$0xff]   ;;  %vm1002_vm2 = vmmov 0   ;;  %s1004_s28 = smov [#allocation2]  }
   0xe   :  { %v910_v11 = vld [vmem:[%s1214_s4 + $0x10] sm:$0xff]   ;;  %v911_v12 = vld [vmem:[%s1214_s4 + $0x8] sm:$0xff]   ;;  %v912_v13 = vld [vmem:[%s1214_s4] sm:$0xff]   ;;  %s729_s29 = sshll.u32 %s1004_s28, 4  ;;  %s730_s29 = int_to_ptr.vmem [resolvable:$true] %s729_s29 }
   0xf   :  { %851 = vmatprep.subr.bf16.mxu1 %v910_v11  ;;  %v746_v16 = vld [vmem:[%s1213_s3] ss:$0 sm:$0xff]  ;;  %p982_p1 = scmp.lt.s32.totalorder %s730_s29, %s730_s29 }
  0x10   :  { %852 = vmatpush3.bf16.msra.mxu1 %v910_v11 }
  0x11   :  { %853 = vmatprep.subr.bf16.mxu1 %v911_v12 }
  0x12   :  { %838 = vmatmul.mubr.msk.bf16.gmra.mxu0 %vm65_vm0, %v904_v6 }
  0x13   :  { %841 = vmatprep.mubr.msk.bf16.mxu0 %vm65_vm0, %v905_v7 }
  0x14   :  { %854 = vmatpush3.bf16.msra.mxu1 %v911_v12 }
  0x15   :  { %855 = vmatprep.subr.bf16.mxu1 %v912_v13 }
  0x18   :  { %856 = vmatpush3.bf16.msra.mxu1 %v912_v13 }
  0x1a   :  { %842 = vmatmul.mubr.msk.bf16.gmra.mxu0 %vm65_vm0, %v906_v8 }
  0x1b   :  { %845 = vmatprep.mubr.msk.bf16.mxu0 %vm65_vm0, %v907_v9 }
  0x22   :  { %846 = vmatmul.mubr.msk.bf16.gmra.mxu0 %vm65_vm0, %v908_v10 }
  0xca   :  { %v835_v14 = vpop.f32.mrf.mxu0 }
  0xcb   :  { %v214_v20 = vadd.f32 %v835_v14, %v746_v16 }
  0xcc   :  { %v205_v15 = vpop.f32.mrf.mxu0 }
  0xcd   :  { %v206_v18 = vadd.f32 %v746_v16, %v205_v15  ;;  %v270_v27 = vmax.f32 %v214_v20, 0.0 }
  0xce   :  { %v836_v17 = vpop.f32.mrf.mxu0 }
  0xcf   :  { %v217_v19 = vadd.f32 %v836_v17, %v746_v16  ;;  %v268_v25 = vmax.f32 %v206_v18, 0.0 }
  0xd0   :  { %v208_v21 = vpop.f32.mrf.mxu0 }
  0xd1   :  { %v209_v22 = vadd.f32 %v746_v16, %v208_v21  ;;  %v271_v23 = vmax.f32 %v217_v19, 0.0  ;;  %v765_v19 = vld [vmem:[%s1215_s5] ss:$0 sm:$0xff]  ;;  %s999_s5 = smov 32  }
  0xd2   :  { %v839_v24 = vpop.f32.mrf.mxu0 }
  0xd3   :  { %v269_v26 = vmax.f32 %v209_v22, 0.0  ;;  %v285_v30 = vpack.c.bf16 %v271_v23, %v270_v27  ;;  %v230_v34 = vadd.f32 %v839_v24, %v746_v16 }
  0xd4   :  { %v221_v28 = vpop.f32.mrf.mxu0 }
  0xd5   :  { %v284_v29 = vpack.c.bf16 %v269_v26, %v268_v25  ;;  %v222_v32 = vadd.f32 %v746_v16, %v221_v28  ;;  %v274_v41 = vmax.f32 %v230_v34, 0.0 }
  0xd6   :  { %v840_v31 = vpop.f32.mrf.mxu0 }
  0xd7   :  { %v233_v33 = vadd.f32 %v840_v31, %v746_v16  ;;  %857 = vmatprep.mubr.msk.bf16.mxu1 %vm331_vm1, %v284_v29  ;;  %v272_v39 = vmax.f32 %v222_v32, 0.0 }
  0xd8   :  { %v224_v35 = vpop.f32.mrf.mxu0  ;;  %858 = vmatmul.mubr.msk.bf16.vlgmr.msra.gmra.mxu1 %vm331_vm1, %v285_v30 }
  0xd9   :  { %v225_v36 = vadd.f32 %v746_v16, %v224_v35  ;;  %v275_v37 = vmax.f32 %v233_v33, 0.0 }
  0xda   :  { %v843_v38 = vpop.f32.mrf.mxu0 }
  0xdb   :  { %v273_v40 = vmax.f32 %v225_v36, 0.0  ;;  %v287_v44 = vpack.c.bf16 %v275_v37, %v274_v41  ;;  %v246_v48 = vadd.f32 %v843_v38, %v746_v16 }
  0xdc   :  { %v237_v42 = vpop.f32.mrf.mxu0 }
  0xdd   :  { %v286_v43 = vpack.c.bf16 %v273_v40, %v272_v39  ;;  %v238_v46 = vadd.f32 %v746_v16, %v237_v42  ;;  %v278_v55 = vmax.f32 %v246_v48, 0.0 }
  0xde   :  { %v844_v45 = vpop.f32.mrf.mxu0 }
  0xdf   :  { %v249_v47 = vadd.f32 %v844_v45, %v746_v16  ;;  %861 = vmatprep.mubr.msk.bf16.mxu1 %vm331_vm1, %v286_v43  ;;  %v276_v53 = vmax.f32 %v238_v46, 0.0 }
  0xe0   :  { %v240_v49 = vpop.f32.mrf.mxu0  ;;  %862 = vmatmul.mubr.msk.bf16.gmra.mxu1 %vm331_vm1, %v287_v44 }
  0xe1   :  { %v241_v50 = vadd.f32 %v746_v16, %v240_v49  ;;  %v279_v51 = vmax.f32 %v249_v47, 0.0 }
  0xe2   :  { %v847_v52 = vpop.f32.mrf.mxu0 }
  0xe3   :  { %v277_v54 = vmax.f32 %v241_v50, 0.0  ;;  %v289_v58 = vpack.c.bf16 %v279_v51, %v278_v55  ;;  %v262_v62 = vadd.f32 %v847_v52, %v746_v16 }
  0xe4   :  { %v253_v56 = vpop.f32.mrf.mxu0 }
  0xe5   :  { %v288_v57 = vpack.c.bf16 %v277_v54, %v276_v53  ;;  %v254_v60 = vadd.f32 %v746_v16, %v253_v56  ;;  %v282_v4 = vmax.f32 %v262_v62, 0.0 }
  0xe6   :  { %v848_v59 = vpop.f32.mrf.mxu0 }
  0xe7   :  { %v265_v61 = vadd.f32 %v848_v59, %v746_v16  ;;  %865 = vmatprep.mubr.msk.bf16.mxu1 %vm331_vm1, %v288_v57  ;;  %v280_v2 = vmax.f32 %v254_v60, 0.0 }
  0xe8   :  { %v256_v63 = vpop.f32.mrf.mxu0  ;;  %866 = vmatmul.mubr.msk.bf16.gmra.mxu1 %vm331_vm1, %v289_v58 }
  0xe9   :  { %v257_v0 = vadd.f32 %v746_v16, %v256_v63  ;;  %v283_v1 = vmax.f32 %v265_v61, 0.0 }
  0xeb   :  { %v281_v3 = vmax.f32 %v257_v0, 0.0  ;;  %v291_v6 = vpack.c.bf16 %v283_v1, %v282_v4 }
  0xed   :  { %v290_v5 = vpack.c.bf16 %v281_v3, %v280_v2 }
  0xef   :  { %869 = vmatprep.mubr.msk.bf16.mxu1 %vm331_vm1, %v290_v5 }
  0xf0   :  { %870 = vmatmul.mubr.msk.bf16.gmra.mxu1 %vm331_vm1, %v291_v6 }
 0x198   :  { %v859_v7 = vpop.f32.mrf.mxu1 }
 0x199   :  { %v1138_v46 = vadd.f32 %v859_v7, %v765_v19 }
 0x19a   :  { %v390_v8 = vpop.f32.mrf.mxu1 }
 0x19b   :  { %v780_v53 = vmul.f32 -1.442695, %v1138_v46  ;;  %v1145_v54 = vadd.f32 %v765_v19, %v390_v8 }
 0x19c   :  { %v860_v9 = vpop.f32.mrf.mxu1 }
 0x19d   :  { %v1141_v49 = vadd.f32 %v860_v9, %v765_v19  ;;  %v778_v63 = vmul.f32 -1.442695, %v1145_v54 }
 0x19e   :  { %v393_v10 = vpop.f32.mrf.mxu1 }
 0x19f   :  { %v781_v58 = vmul.f32 -1.442695, %v1141_v49  ;;  %v1148_v59 = vadd.f32 %v765_v19, %v393_v10 }
 0x1a0   :  { %v863_v11 = vpop.f32.mrf.mxu1 }
 0x1a1   :  { %v1126_v38 = vadd.f32 %v863_v11, %v765_v19  ;;  %v779_v3 = vmul.f32 -1.442695, %v1148_v59 }
 0x1a2   :  { %v406_v12 = vpop.f32.mrf.mxu1 }
 0x1a3   :  { %v1132_v42 = vadd.f32 %v765_v19, %v406_v12  ;;  %v784_v43 = vmul.f32 -1.442695, %v1126_v38 }
 0x1a4   :  { %v864_v13 = vpop.f32.mrf.mxu1 }
 0x1a5   :  { %v1129_v40 = vadd.f32 %v864_v13, %v765_v19  ;;  %v782_v47 = vmul.f32 -1.442695, %v1132_v42 }
 0x1a6   :  { %v409_v14 = vpop.f32.mrf.mxu1 }
 0x1a7   :  { %v1135_v44 = vadd.f32 %v765_v19, %v409_v14  ;;  %v785_v45 = vmul.f32 -1.442695, %v1129_v40 }
 0x1a8   :  { %v867_v15 = vpop.f32.mrf.mxu1 }
 0x1a9   :  { %v1104_v21 = vadd.f32 %v867_v15, %v765_v19  ;;  %v783_v50 = vmul.f32 -1.442695, %v1135_v44 }
 0x1aa   :  { %v422_v16 = vpop.f32.mrf.mxu1 }
 0x1ab   :  { %v788_v28 = vmul.f32 -1.442695, %v1104_v21  ;;  %v1117_v31 = vadd.f32 %v765_v19, %v422_v16 }
 0x1ac   :  { %v868_v17 = vpop.f32.mrf.mxu1 }
 0x1ad   :  { %v1108_v24 = vadd.f32 %v868_v17, %v765_v19  ;;  %v786_v39 = vmul.f32 -1.442695, %v1117_v31 }
 0x1ae   :  { %v425_v18 = vpop.f32.mrf.mxu1 }
 0x1af   :  { %v789_v33 = vmul.f32 -1.442695, %v1108_v24  ;;  %v1123_v36 = vadd.f32 %v765_v19, %v425_v18 }
 0x1b0   :  { %v871_v20 = vpop.f32.mrf.mxu1 }
 0x1b1   :  { %v1106_v22 = vadd.f32 %v871_v20, %v765_v19  ;;  %v787_v41 = vmul.f32 -1.442695, %v1123_v36 }
 0x1b2   :  { %v438_v23 = vpop.f32.mrf.mxu1 }
 0x1b3   :  { %v792_v25 = vmul.f32 -1.442695, %v1106_v22  ;;  %v1111_v26 = vadd.f32 %v765_v19, %v438_v23 }
 0x1b4   :  { %v872_v27 = vpop.f32.mrf.mxu1 }
 0x1b5   :  { %v790_v29 = vmul.f32 -1.442695, %v1111_v26  ;;  %v1115_v30 = vadd.f32 %v872_v27, %v765_v19  ;;  %913 = vpow2.f32 %v792_v25 }
 0x1b6   :  { %v441_v32 = vpop.f32.mrf.mxu1 }
 0x1b7   :  { %v793_v34 = vmul.f32 -1.442695, %v1115_v30  ;;  %v1121_v35 = vadd.f32 %v765_v19, %v441_v32  ;;  %915 = vpow2.f32 %v790_v29 }
 0x1b8   :  { %917 = vpow2.f32 %v788_v28 }
 0x1b9   :  { %v791_v37 = vmul.f32 -1.442695, %v1121_v35  ;;  %919 = vpow2.f32 %v793_v34 }
 0x1ba   :  { %921 = vpow2.f32 %v789_v33 }
 0x1bb   :  { %923 = vpow2.f32 %v791_v37 }
 0x1bc   :  { %925 = vpow2.f32 %v786_v39 }
 0x1bd   :  { %927 = vpow2.f32 %v787_v41 }
 0x1be   :  { %929 = vpow2.f32 %v784_v43 }
 0x1bf   :  { %931 = vpow2.f32 %v785_v45 }
 0x1c0   :  { %933 = vpow2.f32 %v782_v47 }
 0x1c2   :  { %v914_v48 = vpop.eup %913 }
 0x1c3   :  { %v515_v51 = vadd.f32 1.0, %v914_v48 }
 0x1c4   :  { %v916_v52 = vpop.eup %915 }
 0x1c5   :  { %v918_v55 = vpop.eup %917  ;;  %935 = vrcp.f32 %v515_v51  ;;  %v513_v56 = vadd.f32 1.0, %v916_v52 }
 0x1c6   :  { %v920_v57 = vpop.eup %919  ;;  %937 = vpow2.f32 %v783_v50  ;;  %v511_v0 = vadd.f32 1.0, %v918_v55  ;;  %v1000_v50 = vmov 0.0  }
 0x1c7   :  { %v922_v60 = vpop.eup %921  ;;  %939 = vrcp.f32 %v513_v56  ;;  %v516_v61 = vadd.f32 1.0, %v920_v57  ;;  %873 = vmatprep.subr.bf16.mxu0 %v1000_v50  ;;  %66 = vst.msk [vmem:[#allocation2] sm:$0xff] %vm65_vm0, %v1000_v50  ;;  %889 = vmatprep.mubr.msk.bf16.mxu0 %vm1002_vm2, %v1000_v50 }
 0x1c8   :  { %v924_v62 = vpop.eup %923  ;;  %941 = vpow2.f32 %v780_v53  ;;  %v512_v4 = vadd.f32 1.0, %v922_v60 }
 0x1c9   :  { %943 = vrcp.f32 %v516_v61  ;;  %v514_v1 = vadd.f32 1.0, %v924_v62  ;;  %v926_v2 = vpop.eup %925 }
 0x1ca   :  { %945 = vpow2.f32 %v781_v58  ;;  %v928_v5 = vpop.eup %927  ;;  %v509_v6 = vadd.f32 1.0, %v926_v2 }
 0x1cb   :  { %947 = vrcp.f32 %v514_v1  ;;  %v930_v7 = vpop.eup %929  ;;  %v510_v8 = vadd.f32 1.0, %v928_v5 }
 0x1cc   :  { %949 = vpow2.f32 %v778_v63  ;;  %v932_v9 = vpop.eup %931  ;;  %v507_v11 = vadd.f32 1.0, %v930_v7 }
 0x1cd   :  { %951 = vrcp.f32 %v511_v0  ;;  %v934_v10 = vpop.eup %933  ;;  %v508_v14 = vadd.f32 1.0, %v932_v9 }
 0x1ce   :  { %953 = vpow2.f32 %v779_v3  ;;  %v505_v17 = vadd.f32 1.0, %v934_v10 }
 0x1cf   :  { %955 = vrcp.f32 %v512_v4 }
 0x1d0   :  { %957 = vrcp.f32 %v509_v6 }
 0x1d1   :  { %959 = vrcp.f32 %v510_v8 }
 0x1d2   :  { %v936_v12 = vpop.eup %935  ;;  %961 = vrcp.f32 %v507_v11 }
 0x1d3   :  { %v938_v13 = vpop.eup %937  ;;  %593 = vrot.lane.b32.xlu0 %v936_v12, %s999_s5  ;;  %963 = vrcp.f32 %v508_v14 }
 0x1d4   :  { %v940_v15 = vpop.eup %939  ;;  %v506_v20 = vadd.f32 1.0, %v938_v13  ;;  %965 = vrcp.f32 %v505_v17 }
 0x1d5   :  { %v942_v16 = vpop.eup %941  ;;  %589 = vrot.lane.b32.xlu1 %v940_v15, %s999_s5 }
 0x1d6   :  { %v944_v18 = vpop.eup %943  ;;  %v503_v27 = vadd.f32 1.0, %v942_v16  ;;  %967 = vrcp.f32 %v506_v20 }
 0x1d7   :  { %v946_v19 = vpop.eup %945  ;;  %595 = vrot.lane.b32.xlu0 %v944_v18, %s999_s5 }
 0x1d8   :  { %v948_v23 = vpop.eup %947  ;;  %v504_v32 = vadd.f32 1.0, %v946_v19  ;;  %969 = vrcp.f32 %v503_v27 }
 0x1d9   :  { %v950_v25 = vpop.eup %949  ;;  %591 = vrot.lane.b32.xlu1 %v948_v23, %s999_s5 }
 0x1da   :  { %v952_v28 = vpop.eup %951  ;;  %v501_v34 = vadd.f32 1.0, %v950_v25  ;;  %971 = vrcp.f32 %v504_v32  ;;  %v638_v25 = vlaneseq }
 0x1db   :  { %v954_v29 = vpop.eup %953  ;;  %585 = vrot.lane.b32.xlu0 %v952_v28, %s999_s5 }
 0x1dc   :  { %v956_v33 = vpop.eup %955  ;;  %v502_v39 = vadd.f32 1.0, %v954_v29  ;;  %973 = vrcp.f32 %v501_v34  ;;  %v639_v28 = vshrl.u32 %v638_v25, 7  ;;  %v794_v29 = vld [vmem:[%s1211_s1] ss:$0 sm:$0xff]  ;;  %v1003_v34 = vmov 1.0|1.0  }
 0x1dd   :  { %587 = vrot.lane.b32.xlu1 %v956_v33, %s999_s5  ;;  %v958_v37 = vpop.eup %957  ;;  %s977_s1 = scalar_lea.vmem %s730_s29, 128 }
 0x1de   :  { %v960_v41 = vpop.eup %959  ;;  %975 = vrcp.f32 %v502_v39  ;;  %vm644_vm3 = vcmp.eq.s32.totalorder %v639_v28, %v794_v29  ;;  %p978_p0 = scmp.ne.s32.totalorder %s730_s29, %s977_s1  ;;  %p983_p2 = scmp.lt.s32.totalorder %s977_s1, %s977_s1 }
 0x1df   :  { %581 = vrot.lane.b32.xlu0 %v958_v37, %s999_s5  ;;  %v962_v43 = vpop.eup %961  ;;  %vm796_vm4 = vmpackc.low %vm644_vm3, %vm644_vm3  ;;  %v720_v37 = vld [vmem:[#allocation2] sm:$0xff] }
 0x1e0   :  { %v964_v45 = vpop.eup %963  ;;  %p984_p3 = por %p983_p2, %p982_p1 }
 0x1e1   :  { %583 = vrot.lane.b32.xlu1 %v960_v41, %s999_s5  ;;  %v966_v47 = vpop.eup %965 }
 0x1e2   :  { %p985_p4 = pnand %p984_p3, %p978_p0 }
 0x1e3   :  { %577 = vrot.lane.b32.xlu0 %v962_v43, %s999_s5  ;;  %v968_v48 = vpop.eup %967 }
 0x1e5   :  { %579 = vrot.lane.b32.xlu1 %v964_v45, %s999_s5  ;;  %v970_v51 = vpop.eup %969 }
 0x1e7   :  { %573 = vrot.lane.b32.xlu0 %v966_v47, %s999_s5  ;;  %v972_v52 = vpop.eup %971 }
 0x1e9   :  { %575 = vrot.lane.b32.xlu1 %v968_v48, %s999_s5  ;;  %v974_v53 = vpop.eup %973 }
 0x1eb   :  { %569 = vrot.lane.b32.xlu0 %v970_v51, %s999_s5  ;;  %v976_v55 = vpop.eup %975 }
 0x1ed   :  { %571 = vrot.lane.b32.xlu1 %v972_v52, %s999_s5 }
 0x1ef   :  { %565 = vrot.lane.b32.xlu0 %v974_v53, %s999_s5 }
 0x1f1   :  { %567 = vrot.lane.b32.xlu1 %v976_v55, %s999_s5 }
 0x245   :  { %v594_v56 = vpop.permute.xlu0 %593 }
 0x246   :  { %v627_v60 = vmul.f32 %v594_v56, %v1106_v22 }
 0x247   :  { %v590_v57 = vpop.permute.xlu1 %589 }
 0x248   :  { %v625_v63 = vmul.f32 %v590_v57, %v1111_v26 }
 0x249   :  { %v596_v58 = vpop.permute.xlu0 %595 }
 0x24a   :  { %v628_v61 = vmul.f32 %v596_v58, %v1115_v30 }
 0x24b   :  { %v592_v62 = vpop.permute.xlu1 %591 }
 0x24c   :  { %v636_v0 = vpack.c.bf16 %v628_v61, %v627_v60  ;;  %v626_v1 = vmul.f32 %v592_v62, %v1121_v35 }
 0x24d   :  { %v586_v2 = vpop.permute.xlu0 %585 }
 0x24e   :  { %v635_v3 = vpack.c.bf16 %v626_v1, %v625_v63  ;;  %670 = vrot.lane.b32.xlu0 %v636_v0, %s1001_s25  ;;  %v623_v5 = vmul.f32 %v586_v2, %v1104_v21 }
 0x24f   :  { %v588_v4 = vpop.permute.xlu1 %587 }
 0x250   :  { %v624_v6 = vmul.f32 %v588_v4, %v1108_v24  ;;  %668 = vrot.lane.b32.xlu1 %v635_v3, %s1001_s25 }
 0x251   :  { %v582_v22 = vpop.permute.xlu0 %581 }
 0x252   :  { %v634_v30 = vpack.c.bf16 %v624_v6, %v623_v5  ;;  %v621_v26 = vmul.f32 %v582_v22, %v1117_v31 }
 0x253   :  { %v584_v7 = vpop.permute.xlu1 %583 }
 0x254   :  { %v622_v8 = vmul.f32 %v584_v7, %v1123_v36  ;;  %666 = vrot.lane.b32.xlu0 %v634_v30, %s1001_s25 }
 0x255   :  { %v578_v35 = vpop.permute.xlu0 %577 }
 0x256   :  { %v633_v9 = vpack.c.bf16 %v622_v8, %v621_v26  ;;  %v619_v11 = vmul.f32 %v578_v35, %v1126_v38 }
 0x257   :  { %v580_v10 = vpop.permute.xlu1 %579 }
 0x258   :  { %v620_v21 = vmul.f32 %v580_v10, %v1129_v40  ;;  %664 = vrot.lane.b32.xlu1 %v633_v9, %s1001_s25 }
 0x259   :  { %v574_v24 = vpop.permute.xlu0 %573 }
 0x25a   :  { %v632_v12 = vpack.c.bf16 %v620_v21, %v619_v11  ;;  %v617_v14 = vmul.f32 %v574_v24, %v1132_v42 }
 0x25b   :  { %v576_v13 = vpop.permute.xlu1 %575 }
 0x25c   :  { %v618_v31 = vmul.f32 %v576_v13, %v1135_v44  ;;  %662 = vrot.lane.b32.xlu0 %v632_v12, %s1001_s25 }
 0x25d   :  { %v570_v36 = vpop.permute.xlu0 %569 }
 0x25e   :  { %v631_v15 = vpack.c.bf16 %v618_v31, %v617_v14  ;;  %v615_v38 = vmul.f32 %v570_v36, %v1138_v46 }
 0x25f   :  { %v572_v16 = vpop.permute.xlu1 %571 }
 0x260   :  { %v616_v40 = vmul.f32 %v572_v16, %v1141_v49  ;;  %660 = vrot.lane.b32.xlu1 %v631_v15, %s1001_s25 }
 0x261   :  { %v566_v17 = vpop.permute.xlu0 %565 }
 0x262   :  { %v630_v18 = vpack.c.bf16 %v616_v40, %v615_v38  ;;  %v613_v42 = vmul.f32 %v566_v17, %v1145_v54 }
 0x263   :  { %v568_v19 = vpop.permute.xlu1 %567 }
 0x264   :  { %v614_v44 = vmul.f32 %v568_v19, %v1148_v59  ;;  %658 = vrot.lane.b32.xlu0 %v630_v18, %s1001_s25 }
 0x266   :  { %v629_v20 = vpack.c.bf16 %v614_v44, %v613_v42 }
 0x268   :  { %656 = vrot.lane.b32.xlu1 %v629_v20, %s1001_s25 }
 0x2c0   :  { %v671_v23 = vpop.permute.xlu0 %670 }
 0x2c1   :  { %874 = vmatpush3.bf16.msra.mxu0 %v671_v23 }
 0x2c2   :  { %875 = vmatprep.subr.bf16.mxu0 %v1000_v50  ;;  %v669_v46 = vpop.permute.xlu1 %668 }
 0x2c5   :  { %876 = vmatpush3.bf16.msra.mxu0 %v669_v46 }
 0x2c6   :  { %877 = vmatprep.subr.bf16.mxu0 %v1000_v50  ;;  %v667_v49 = vpop.permute.xlu0 %666 }
 0x2c9   :  { %878 = vmatpush3.bf16.msra.mxu0 %v667_v49 }
 0x2ca   :  { %879 = vmatprep.subr.bf16.mxu0 %v1000_v50  ;;  %v665_v54 = vpop.permute.xlu1 %664 }
 0x2cd   :  { %880 = vmatpush3.bf16.msra.mxu0 %v665_v54 }
 0x2ce   :  { %881 = vmatprep.subr.bf16.mxu0 %v1000_v50  ;;  %v663_v59 = vpop.permute.xlu0 %662 }
 0x2d1   :  { %882 = vmatpush3.bf16.msra.mxu0 %v663_v59 }
 0x2d2   :  { %883 = vmatprep.subr.bf16.mxu0 %v1000_v50  ;;  %v661_v27 = vpop.permute.xlu1 %660 }
 0x2d5   :  { %884 = vmatpush3.bf16.msra.mxu0 %v661_v27 }
 0x2d6   :  { %885 = vmatprep.subr.bf16.mxu0 %v1000_v50  ;;  %v659_v32 = vpop.permute.xlu0 %658 }
 0x2d9   :  { %886 = vmatpush3.bf16.msra.mxu0 %v659_v32 }
 0x2da   :  { %887 = vmatprep.subr.bf16.mxu0 %v1000_v50  ;;  %v657_v33 = vpop.permute.xlu1 %656 }
 0x2dd   :  { %888 = vmatpush3.bf16.msra.mxu0 %v657_v33 }
 0x2e0   :  { %890 = vmatmul.mubr.msk.bf16.vlgmr.msra.gmra.mxu0 %vm796_vm4, %v1003_v34 }
 0x3a0   :  { %v714_v39 = vpop.f32.mrf.mxu0 }
 0x3a1   :  { %v721_v41 = vadd.f32 %v720_v37, %v714_v39 }
 0x3a2   :  { %v891_v43 = vpop.f32.mrf.mxu0 }
 0x3a3   :  { %722 = vst.msk [vmem:[#allocation2] sm:$0xff] %vm65_vm0, %v721_v41 }
 0x3a4   :  { %v717_v45 = vpop.f32.mrf.mxu0 }
 0x3a5   :  { %988 = shalt.err (!%p985_p4)
}
 0x3a6   :  { %732 = dma.vmem_to_hbm [thread:$0]  %s730_s29, 128, %s1216_s6, [#allocation3]   ;;  %v892_v47 = vpop.f32.mrf.mxu0 }
 0x3a7   :  { %997 = dma.done.wait [#allocation3], 128  }
 0x3a8   :  { %998 = vsyncadd [#allocation3], 4294967168 }
 0x3a9   :  { %736 = vsyncpa [#allocation3], 1 }

</bundles_post_ra>
